<compile_context>
chip_gen: v6e
topology: v6e:2x2x1
jax: 0.10.0
libtpu: 0.0.40
codegen_flags: <defaults>
</compile_context>

<pallas_src>
import jax
import jax.numpy as jnp
from jax import lax
from jax.experimental import pallas as pl
from jax.experimental.pallas import tpu as pltpu

ROBERTA_HIDDEN = 768   # RobertaModel('mrm8488/chEMBL_smiles_v1').config.hidden_size
HIDDEN_SIZE = 256
ACTION_SIZE = 40
HEAD_OUT = 128         # fused head output width (40 action + 1 value + zero pad), lane-dense
MAX_TB = 256           # batch-tile cap; fills MXU rows on v6e/v7x (use 128 on v5e)


def _round_up(x, m):
    return ((x + m - 1) // m) * m


def policy_kernel(x_ref, w1_ref, b1_ref, wh_ref, bh_ref, out_ref):
    # x: (TB, 768) f32 -> bf16 for the MXU; accumulation stays f32.
    x = x_ref[...].astype(jnp.bfloat16)

    # affine1 + ReLU
    h = jnp.dot(x, w1_ref[...], preferred_element_type=jnp.float32) + b1_ref[...]
    h = jnp.maximum(h, 0.0)

    # dropout: identity (inference)

    # fused heads: one MXU matmul -> (TB, 128); cols [0:40] action logits, [40] value
    z = (jnp.dot(h.astype(jnp.bfloat16), wh_ref[...],
                 preferred_element_type=jnp.float32) + bh_ref[...])

    # softmax over the first ACTION_SIZE lanes only (mask the padded lanes)
    lane = lax.broadcasted_iota(jnp.int32, z.shape, dimension=1)
    is_action = lane < ACTION_SIZE
    logits = jnp.where(is_action, z, -jnp.inf)
    m = jnp.max(logits, axis=-1, keepdims=True)
    e = jnp.exp(logits - m)                       # padded lanes -> exp(-inf) = 0
    s = jnp.sum(e, axis=-1, keepdims=True)
    aprob = e / s                                 # exact divide: rows sum to 1

    # action-prob in the first 40 lanes, raw head output (value @ col 40) elsewhere.
    out_ref[...] = jnp.where(is_action, aprob, z).astype(out_ref.dtype)


def prepare_policy_params(w1, b1, wa, ba, wv, bv):
    """One-time parameter prep: fuse the two heads into a lane-dense (256, 128)
    slab and store the matmul weights as bf16 (halves weight HBM traffic)."""
    pad_cols = HEAD_OUT - ACTION_SIZE - 1
    wh = jnp.concatenate(
        [wa, wv, jnp.zeros((HIDDEN_SIZE, pad_cols), jnp.float32)], axis=1)
    bh = jnp.concatenate(
        [ba, bv, jnp.zeros((1, pad_cols), jnp.float32)], axis=1)
    return (w1.astype(jnp.bfloat16), b1,
            wh.astype(jnp.bfloat16), bh)


def policy_forward(cls_repr, w1_bf, b1, wh_bf, bh):
    """cls_repr: (B, 768) float32 -> (action_prob (B, 40), state_value (B, 1))."""
    B = cls_repr.shape[0]

    # Adaptive batch tile: multiple of the f32 sublane (8), capped at MAX_TB.
    TB = min(_round_up(B, 8), MAX_TB)
    Bp = _round_up(B, TB)
    if Bp != B:
        cls_repr = jnp.pad(cls_repr, ((0, Bp - B), (0, 0)))

    out = pl.pallas_call(
        policy_kernel,
        out_shape=jax.ShapeDtypeStruct((Bp, HEAD_OUT), jnp.float32),
        grid=(Bp // TB,),
        in_specs=[
            pl.BlockSpec((TB, ROBERTA_HIDDEN), lambda i: (i, 0)),           # x: tiled over batch
            pl.BlockSpec((ROBERTA_HIDDEN, HIDDEN_SIZE), lambda i: (0, 0)),  # w1 (bf16): resident
            pl.BlockSpec((1, HIDDEN_SIZE), lambda i: (0, 0)),               # b1: resident
            pl.BlockSpec((HIDDEN_SIZE, HEAD_OUT), lambda i: (0, 0)),        # fused head W (bf16)
            pl.BlockSpec((1, HEAD_OUT), lambda i: (0, 0)),                  # fused head b
        ],
        out_specs=pl.BlockSpec((TB, HEAD_OUT), lambda i: (i, 0)),
        compiler_params=pltpu.CompilerParams(
            dimension_semantics=("parallel",),   # shards batch tiles across TCs (v7x)
            vmem_limit_bytes=8 << 20,            # real footprint ~3 MiB even at TB=256
        ),
    )(cls_repr, w1_bf, b1, wh_bf, bh)

    action_prob = out[:B, :ACTION_SIZE]
    state_value = out[:B, ACTION_SIZE:ACTION_SIZE + 1]
    return action_prob, state_value


def init_params(key):
    """Deterministic synthetic parameters (shapes from Policy.__init__)."""
    k1, k2, k3, k4, k5, k6 = jax.random.split(key, 6)
    scale1 = 1.0 / jnp.sqrt(ROBERTA_HIDDEN)
    scale2 = 1.0 / jnp.sqrt(HIDDEN_SIZE)
    w1 = jax.random.uniform(k1, (ROBERTA_HIDDEN, HIDDEN_SIZE), jnp.float32, -scale1, scale1)
    b1 = jax.random.uniform(k2, (1, HIDDEN_SIZE), jnp.float32, -scale1, scale1)
    wa = jax.random.uniform(k3, (HIDDEN_SIZE, ACTION_SIZE), jnp.float32, -scale2, scale2)
    ba = jax.random.uniform(k4, (1, ACTION_SIZE), jnp.float32, -scale2, scale2)
    wv = jax.random.uniform(k5, (HIDDEN_SIZE, 1), jnp.float32, -scale2, scale2)
    bv = jax.random.uniform(k6, (1, 1), jnp.float32, -scale2, scale2)
    return w1, b1, wa, ba, wv, bv


if __name__ == "__main__":
    key = jax.random.PRNGKey(0)
    k_x, k_p = jax.random.split(key)

    B = 4  # small batch of "SMILES strings"
    # Synthetic CLS representation standing in for RobertaModel(...).last_hidden_state[:, 0, :]
    cls_repr = jax.random.normal(k_x, (B, ROBERTA_HIDDEN), dtype=jnp.float32)

    raw_params = init_params(k_p)
    params = prepare_policy_params(*raw_params)      # fused head / bf16 weights, built once

    fwd = jax.jit(policy_forward)                    # pad + slices fuse with the pallas_call
    action_prob, state_value = fwd(cls_repr, *params)
    jax.block_until_ready((action_prob, state_value))

    # Reference check in plain JAX (same math: bf16 matmul inputs, f32 accumulation,
    # f32 biases, no dropout at inference).
    w1, b1, wa, ba, wv, bv = raw_params
    x_bf = cls_repr.astype(jnp.bfloat16)
    h_ref = jnp.maximum(
        jnp.dot(x_bf, w1.astype(jnp.bfloat16), preferred_element_type=jnp.float32) + b1, 0.0)
    h_bf = h_ref.astype(jnp.bfloat16)
    ap_ref = jax.nn.softmax(
        jnp.dot(h_bf, wa.astype(jnp.bfloat16), preferred_element_type=jnp.float32) + ba, axis=-1)
    sv_ref = jnp.dot(h_bf, wv.astype(jnp.bfloat16), preferred_element_type=jnp.float32) + bv

    assert action_prob.shape == (B, ACTION_SIZE)
    assert state_value.shape == (B, 1)
    assert jnp.allclose(action_prob, ap_ref, atol=1e-4)
    assert jnp.allclose(state_value, sv_ref, atol=1e-4)
    # Exact softmax divide -> rows sum to 1 to fp32 precision.
    assert jnp.allclose(jnp.sum(action_prob, axis=-1), 1.0, atol=1e-5)

    print("KERNEL_OK")
</pallas_src>

<mosaic_0001>
module attributes {stable_mosaic.version = 11 : i64} {
  func.func @policy_kernel(%arg0: i32, %arg1: memref<8x768xf32, #tpu.memory_space<vmem>>, %arg2: memref<768x256xbf16, #tpu.memory_space<vmem>>, %arg3: memref<1x256xf32, #tpu.memory_space<vmem>>, %arg4: memref<256x128xbf16, #tpu.memory_space<vmem>>, %arg5: memref<1x128xf32, #tpu.memory_space<vmem>>, %arg6: memref<8x128xf32, #tpu.memory_space<vmem>>) attributes {dimension_semantics = [#tpu.dimension_semantics<parallel>], iteration_bounds = array<i64: 1>, scalar_prefetch = 0 : i64, scratch_operands = 0 : i64, tpu.core_type = #tpu.core_type<tc>, window_params = [{transform_indices = @transform_0, window_bounds = array<i64: 8, 768>}, {pipeline_mode = #tpu.pipeline_mode<synchronous>, transform_indices = @transform_1, window_bounds = array<i64: 768, 256>}, {pipeline_mode = #tpu.pipeline_mode<synchronous>, transform_indices = @transform_2, window_bounds = array<i64: 1, 256>}, {pipeline_mode = #tpu.pipeline_mode<synchronous>, transform_indices = @transform_3, window_bounds = array<i64: 256, 128>}, {pipeline_mode = #tpu.pipeline_mode<synchronous>, transform_indices = @transform_4, window_bounds = array<i64: 1, 128>}, {transform_indices = @transform_5, window_bounds = array<i64: 8, 128>}]} {
    %c0 = arith.constant 0 : index
    %c0_0 = arith.constant 0 : index
    %0 = vector.load %arg1[%c0, %c0_0] : memref<8x768xf32, #tpu.memory_space<vmem>>, vector<8x768xf32>
    %1 = arith.truncf %0 : vector<8x768xf32> to vector<8x768xbf16>
    %c0_1 = arith.constant 0 : index
    %c0_2 = arith.constant 0 : index
    %2 = vector.load %arg2[%c0_1, %c0_2] : memref<768x256xbf16, #tpu.memory_space<vmem>>, vector<768x256xbf16>
    %cst = arith.constant dense<0.000000e+00> : vector<8x256xf32>
    %3 = tpu.matmul %1, %2, %cst {dimension_numbers = #tpu.dot_dimension_numbers<[1], [0], [0], [1], [0, 0, 1, 1], [], []>} : vector<8x768xbf16>, vector<768x256xbf16>, vector<8x256xf32> -> vector<8x256xf32>
    %c0_3 = arith.constant 0 : index
    %c0_4 = arith.constant 0 : index
    %4 = vector.load %arg3[%c0_3, %c0_4] : memref<1x256xf32, #tpu.memory_space<vmem>>, vector<1x256xf32>
    %5 = vector.broadcast %4 : vector<1x256xf32> to vector<8x256xf32>
    %6 = arith.addf %3, %5 : vector<8x256xf32>
    %cst_5 = arith.constant 0.000000e+00 : f32
    %7 = vector.broadcast %cst_5 : f32 to vector<8x256xf32>
    %8 = arith.maximumf %6, %7 : vector<8x256xf32>
    %9 = arith.truncf %8 : vector<8x256xf32> to vector<8x256xbf16>
    %c0_6 = arith.constant 0 : index
    %c0_7 = arith.constant 0 : index
    %10 = vector.load %arg4[%c0_6, %c0_7] : memref<256x128xbf16, #tpu.memory_space<vmem>>, vector<256x128xbf16>
    %cst_8 = arith.constant dense<0.000000e+00> : vector<8x128xf32>
    %11 = tpu.matmul %9, %10, %cst_8 {dimension_numbers = #tpu.dot_dimension_numbers<[1], [0], [0], [1], [0, 0, 1, 1], [], []>} : vector<8x256xbf16>, vector<256x128xbf16>, vector<8x128xf32> -> vector<8x128xf32>
    %c0_9 = arith.constant 0 : index
    %c0_10 = arith.constant 0 : index
    %12 = vector.load %arg5[%c0_9, %c0_10] : memref<1x128xf32, #tpu.memory_space<vmem>>, vector<1x128xf32>
    %13 = vector.broadcast %12 : vector<1x128xf32> to vector<8x128xf32>
    %14 = arith.addf %11, %13 : vector<8x128xf32>
    %15 = tpu.iota {dimensions = array<i32: 1>} : vector<8x128xi32>
    %c40_i32 = arith.constant 40 : i32
    %16 = vector.broadcast %c40_i32 : i32 to vector<8x128xi32>
    %17 = arith.cmpi slt, %15, %16 : vector<8x128xi32>
    %cst_11 = arith.constant 0xFF800000 : f32
    %18 = vector.broadcast %cst_11 : f32 to vector<8x128xf32>
    %19 = arith.select %17, %14, %18 : vector<8x128xi1>, vector<8x128xf32>
    %cst_12 = arith.constant dense<0xFF800000> : vector<8xf32>
    %20 = vector.multi_reduction <maximumf>, %19, %cst_12 [1] : vector<8x128xf32> to vector<8xf32>
    %21 = vector.shape_cast %20 : vector<8xf32> to vector<8x1xf32>
    %22 = vector.broadcast %21 : vector<8x1xf32> to vector<8x128xf32>
    %23 = arith.subf %19, %22 : vector<8x128xf32>
    %24 = math.exp %23 : vector<8x128xf32>
    %cst_13 = arith.constant dense<0.000000e+00> : vector<8xf32>
    %25 = vector.multi_reduction <add>, %24, %cst_13 [1] : vector<8x128xf32> to vector<8xf32>
    %26 = vector.shape_cast %25 : vector<8xf32> to vector<8x1xf32>
    %27 = vector.broadcast %26 : vector<8x1xf32> to vector<8x128xf32>
    %28 = arith.divf %24, %27 : vector<8x128xf32>
    %29 = arith.select %17, %28, %14 : vector<8x128xi1>, vector<8x128xf32>
    %c0_14 = arith.constant 0 : index
    %c0_15 = arith.constant 0 : index
    %30 = vector.load %arg6[%c0_14, %c0_15] : memref<8x128xf32, #tpu.memory_space<vmem>>, vector<8x128xf32>
    tpu.vector_store %arg6[%c0_14, %c0_15], %29 {strides = array<i32>} : memref<8x128xf32, #tpu.memory_space<vmem>>, vector<8x128xf32>,
    return
  }
  func.func @transform_0(%arg0: i32) -> (i32, i32) {
    %c0_i32 = arith.constant 0 : i32
    %c0_i32_0 = arith.constant 0 : i32
    return %arg0, %c0_i32 : i32, i32
  }
  func.func @transform_1(%arg0: i32) -> (i32, i32) {
    %c0_i32 = arith.constant 0 : i32
    %c0_i32_0 = arith.constant 0 : i32
    %c0_i32_1 = arith.constant 0 : i32
    return %c0_i32, %c0_i32_0 : i32, i32
  }
  func.func @transform_2(%arg0: i32) -> (i32, i32) {
    %c0_i32 = arith.constant 0 : i32
    %c0_i32_0 = arith.constant 0 : i32
    %c0_i32_1 = arith.constant 0 : i32
    return %c0_i32, %c0_i32_0 : i32, i32
  }
  func.func @transform_3(%arg0: i32) -> (i32, i32) {
    %c0_i32 = arith.constant 0 : i32
    %c0_i32_0 = arith.constant 0 : i32
    %c0_i32_1 = arith.constant 0 : i32
    return %c0_i32, %c0_i32_0 : i32, i32
  }
  func.func @transform_4(%arg0: i32) -> (i32, i32) {
    %c0_i32 = arith.constant 0 : i32
    %c0_i32_0 = arith.constant 0 : i32
    %c0_i32_1 = arith.constant 0 : i32
    return %c0_i32, %c0_i32_0 : i32, i32
  }
  func.func @transform_5(%arg0: i32) -> (i32, i32) {
    %c0_i32 = arith.constant 0 : i32
    %c0_i32_0 = arith.constant 0 : i32
    return %arg0, %c0_i32 : i32, i32
  }
}

</mosaic_0001>

<bundles_post_ra>
// kernel: policy_forward.1
= control target key start
LH: loop header
LB: loop body
LE: loop exit
PB: predicated region body
PF: predicated region fallthrough
CT: control target
= control target key end

     0   :  { %10 = vsyncpa [#allocation3], 0  ;;  %s1390_s0 = inlined_call_operand.vmem [shape: f32[8,768], index: 0, kind: input, shape index: {}]   ;;  %s1391_s1 = inlined_call_operand.hbm [shape: bf16[768,256], index: 1, kind: input, shape index: {}]   ;;  %s1392_s2 = inlined_call_operand.vmem [shape: f32[1,256], index: 2, kind: input, shape index: {}]   ;;  %s1393_s3 = inlined_call_operand.hbm [shape: bf16[256,128], index: 3, kind: input, shape index: {}]   ;;  %s1394_s4 = inlined_call_operand.vmem [shape: f32[1,128], index: 4, kind: input, shape index: {}]   ;;  %s1395_s5 = inlined_call_operand.vmem [shape: f32[8,128], index: 5, kind: output, shape index: {}]  }
   0x1   :  { %11 = vsyncpa [#allocation5], 0  ;;  %s1321_s18 = smov [#allocation2]  }
   0x2   :  { %s19_s19 = sshll.u32 %s1321_s18, 4  ;;  %s20_s19 = int_to_ptr.vmem [resolvable:$true] %s19_s19 }
   0x3   :  { %s1285_s20 = scalar_lea.vmem %s20_s19, 12288  ;;  %p1290_p1 = scmp.lt.s32.totalorder %s20_s19, %s20_s19 }
   0x4   :  { %p1286_p0 = scmp.ne.s32.totalorder %s20_s19, %s1285_s20  ;;  %p1291_p2 = scmp.lt.s32.totalorder %s1285_s20, %s1285_s20 }
   0x6   :  { %p1292_p3 = por %p1291_p2, %p1290_p1 }
   0x8   :  { %p1293_p4 = pnand %p1292_p3, %p1286_p0 }
   0xa   :  { %1296 = shalt.err (!%p1293_p4)
}
   0xb   :  { %s1322_s21 = smov 128   ;;  %s1323_s22 = smov 8  }
   0xc   :  { %25 = dma.hbm_to_vmem [thread:$0]  %s1391_s1, 12288, %s20_s19, [#allocation3], %s1322_s21, %s1322_s21, %s1323_s22  }
   0xd   :  { %s1324_s25 = smov [#allocation4]  }
   0xe   :  { %s33_s26 = sshll.u32 %s1324_s25, 4  ;;  %s34_s26 = int_to_ptr.vmem [resolvable:$true] %s33_s26 }
   0xf   :  { %s1305_s27 = scalar_lea.vmem %s34_s26, 2048  ;;  %p1310_p6 = scmp.lt.s32.totalorder %s34_s26, %s34_s26 }
  0x10   :  { %p1306_p5 = scmp.ne.s32.totalorder %s34_s26, %s1305_s27  ;;  %p1311_p7 = scmp.lt.s32.totalorder %s1305_s27, %s1305_s27 }
  0x12   :  { %p1312_p8 = por %p1311_p7, %p1310_p6 }
  0x14   :  { %p1313_p9 = pnand %p1312_p8, %p1306_p5 }
  0x16   :  { %1316 = shalt.err (!%p1313_p9)
}
  0x17   :  { %s1325_s28 = smov 64   ;;  %s1326_s29 = smov 4  }
  0x18   :  { %39 = dma.hbm_to_vmem [thread:$0]  %s1393_s3, 2048, %s34_s26, [#allocation5], %s1325_s28, %s1325_s28, %s1326_s29  }
  0x19   :  { %1317 = dma.done.wait [#allocation3], 12288  }
  0x1a   :  { %1318 = vsyncadd [#allocation3], 4294955008 }
  0x1b   :  { %1319 = dma.done.wait [#allocation5], 2048  }
  0x1c   :  { %1320 = vsyncadd [#allocation5], 4294965248  ;;  %v1113_v0 = vld [vmem:[#allocation2 + $0x74] ss:$8 sps:$4 sm:$0xff]   ;;  %v1115_v1 = vld [vmem:[#allocation2 + $0x70] ss:$8 sps:$4 sm:$0xff]  }
  0x1d   :  { %649 = vmatprep.subr.bf16.mxu0 %v1113_v0  ;;  %v1116_v2 = vld [vmem:[#allocation2 + $0x174] ss:$8 sps:$4 sm:$0xff]   ;;  %v1118_v3 = vld [vmem:[#allocation2 + $0x170] ss:$8 sps:$4 sm:$0xff]   ;;  %v1119_v4 = vld [vmem:[#allocation2 + $0x64] ss:$8 sps:$4 sm:$0xff]  }
  0x1e   :  { %650 = vmatpush1.bf16.msra.mxu0 %v1115_v1  ;;  %v1121_v5 = vld [vmem:[#allocation2 + $0x60] ss:$8 sps:$4 sm:$0xff]   ;;  %690 = vmatprep.subr.bf16.mxu1 %v1116_v2  ;;  %v1122_v6 = vld [vmem:[#allocation2 + $0x164] ss:$8 sps:$4 sm:$0xff]   ;;  %v1125_v8 = vld [vmem:[#allocation2 + $0x54] ss:$8 sps:$4 sm:$0xff]  }
  0x1f   :  { %691 = vmatpush1.bf16.msra.mxu1 %v1118_v3  ;;  %651 = vmatprep.subr.bf16.mxu0 %v1119_v4  ;;  %v1124_v7 = vld [vmem:[#allocation2 + $0x160] ss:$8 sps:$4 sm:$0xff]   ;;  %v1127_v9 = vld [vmem:[#allocation2 + $0x50] ss:$8 sps:$4 sm:$0xff]   ;;  %v1128_v10 = vld [vmem:[#allocation2 + $0x154] ss:$8 sps:$4 sm:$0xff]  }
  0x20   :  { %692 = vmatprep.subr.bf16.mxu1 %v1122_v6  ;;  %v1131_v11 = vld [vmem:[#allocation2 + $0x44] ss:$8 sps:$4 sm:$0xff]   ;;  %v1130_v12 = vld [vmem:[#allocation2 + $0x150] ss:$8 sps:$4 sm:$0xff]   ;;  %v1133_v14 = vld [vmem:[#allocation2 + $0x40] ss:$8 sps:$4 sm:$0xff]  }
  0x21   :  { %v1134_v13 = vld [vmem:[#allocation2 + $0x144] ss:$8 sps:$4 sm:$0xff]   ;;  %v1137_v15 = vld [vmem:[#allocation2 + $0x34] ss:$8 sps:$4 sm:$0xff]   ;;  %v1136_v16 = vld [vmem:[#allocation2 + $0x140] ss:$8 sps:$4 sm:$0xff]  }
  0x22   :  { %652 = vmatpush1.bf16.msra.mxu0 %v1121_v5  ;;  %v1140_v17 = vld [vmem:[#allocation2 + $0x134] ss:$8 sps:$4 sm:$0xff]   ;;  %v1139_v18 = vld [vmem:[#allocation2 + $0x30] ss:$8 sps:$4 sm:$0xff]   ;;  %v1143_v19 = vld [vmem:[#allocation2 + $0x24] ss:$8 sps:$4 sm:$0xff]  }
  0x23   :  { %653 = vmatprep.subr.bf16.mxu0 %v1125_v8  ;;  %693 = vmatpush1.bf16.msra.mxu1 %v1124_v7  ;;  %v1142_v20 = vld [vmem:[#allocation2 + $0x130] ss:$8 sps:$4 sm:$0xff]   ;;  %v1146_v21 = vld [vmem:[#allocation2 + $0x124] ss:$8 sps:$4 sm:$0xff]   ;;  %v1145_v22 = vld [vmem:[#allocation2 + $0x20] ss:$8 sps:$4 sm:$0xff]  }
  0x24   :  { %694 = vmatprep.subr.bf16.mxu1 %v1128_v10  ;;  %v1149_v23 = vld [vmem:[#allocation2 + $0x14] ss:$8 sps:$4 sm:$0xff]   ;;  %v1148_v24 = vld [vmem:[#allocation2 + $0x120] ss:$8 sps:$4 sm:$0xff]   ;;  %v1151_v26 = vld [vmem:[#allocation2 + $0x10] ss:$8 sps:$4 sm:$0xff]  }
  0x25   :  { %v1152_v25 = vld [vmem:[#allocation2 + $0x114] ss:$8 sps:$4 sm:$0xff]   ;;  %v1155_v27 = vld [vmem:[#allocation2 + $0x4] ss:$8 sps:$4 sm:$0xff]   ;;  %v1154_v28 = vld [vmem:[#allocation2 + $0x110] ss:$8 sps:$4 sm:$0xff]  }
  0x26   :  { %654 = vmatpush1.bf16.msra.mxu0 %v1127_v9  ;;  %v1158_v29 = vld [vmem:[#allocation2 + $0x104] ss:$8 sps:$4 sm:$0xff]   ;;  %v1157_v30 = vld [vmem:[#allocation2] ss:$8 sps:$4 sm:$0xff]   ;;  %v1161_v31 = vld [vmem:[#allocation2 + $0xf4] ss:$8 sps:$4 sm:$0xff]  }
  0x27   :  { %655 = vmatprep.subr.bf16.mxu0 %v1131_v11  ;;  %695 = vmatpush1.bf16.msra.mxu1 %v1130_v12  ;;  %v1160_v32 = vld [vmem:[#allocation2 + $0x100] ss:$8 sps:$4 sm:$0xff]   ;;  %v1164_v33 = vld [vmem:[#allocation2 + $0x1f4] ss:$8 sps:$4 sm:$0xff]   ;;  %v1163_v34 = vld [vmem:[#allocation2 + $0xf0] ss:$8 sps:$4 sm:$0xff]  }
  0x28   :  { %696 = vmatprep.subr.bf16.mxu1 %v1134_v13  ;;  %v1167_v35 = vld [vmem:[#allocation2 + $0xe4] ss:$8 sps:$4 sm:$0xff]   ;;  %v1166_v36 = vld [vmem:[#allocation2 + $0x1f0] ss:$8 sps:$4 sm:$0xff]   ;;  %v1169_v38 = vld [vmem:[#allocation2 + $0xe0] ss:$8 sps:$4 sm:$0xff]  }
  0x29   :  { %v1170_v37 = vld [vmem:[#allocation2 + $0x1e4] ss:$8 sps:$4 sm:$0xff]   ;;  %v1173_v39 = vld [vmem:[#allocation2 + $0xd4] ss:$8 sps:$4 sm:$0xff]   ;;  %v1172_v40 = vld [vmem:[#allocation2 + $0x1e0] ss:$8 sps:$4 sm:$0xff]  }
  0x2a   :  { %656 = vmatpush1.bf16.msra.mxu0 %v1133_v14  ;;  %v1176_v41 = vld [vmem:[#allocation2 + $0x1d4] ss:$8 sps:$4 sm:$0xff]   ;;  %v1175_v42 = vld [vmem:[#allocation2 + $0xd0] ss:$8 sps:$4 sm:$0xff]   ;;  %v1179_v43 = vld [vmem:[#allocation2 + $0xc4] ss:$8 sps:$4 sm:$0xff]  }
  0x2b   :  { %657 = vmatprep.subr.bf16.mxu0 %v1137_v15  ;;  %697 = vmatpush1.bf16.msra.mxu1 %v1136_v16  ;;  %v1178_v44 = vld [vmem:[#allocation2 + $0x1d0] ss:$8 sps:$4 sm:$0xff]   ;;  %v1182_v45 = vld [vmem:[#allocation2 + $0x1c4] ss:$8 sps:$4 sm:$0xff]   ;;  %v1181_v47 = vld [vmem:[#allocation2 + $0xc0] ss:$8 sps:$4 sm:$0xff]  }
  0x2c   :  { %698 = vmatprep.subr.bf16.mxu1 %v1140_v17  ;;  %v50_v46 = vld [vmem:[%s1390_s0 + $0x8] sm:$0xff]  ;;  %v1185_v49 = vld [vmem:[#allocation2 + $0xb4] ss:$8 sps:$4 sm:$0xff]   ;;  %v1187_v54 = vld [vmem:[#allocation2 + $0xb0] ss:$8 sps:$4 sm:$0xff]  }
  0x2d   :  { %v56_v48 = vpack.c.bf16 %v50_v46, %v50_v46  ;;  %v52_v50 = vld [vmem:[%s1390_s0 + $0x18] sm:$0xff]  ;;  %v1184_v51 = vld [vmem:[#allocation2 + $0x1c0] ss:$8 sps:$4 sm:$0xff]   ;;  %v1191_v55 = vld [vmem:[#allocation2 + $0xa4] ss:$8 sps:$4 sm:$0xff]  }
  0x2e   :  { %658 = vmatpush1.bf16.msra.mxu0 %v1139_v18  ;;  %v58_v52 = vpack.c.bf16 %v52_v50, %v52_v50  ;;  %v1188_v53 = vld [vmem:[#allocation2 + $0x1b4] ss:$8 sps:$4 sm:$0xff]   ;;  %v1190_v56 = vld [vmem:[#allocation2 + $0x1b0] ss:$8 sps:$4 sm:$0xff]   ;;  %v1194_v57 = vld [vmem:[#allocation2 + $0x1a4] ss:$8 sps:$4 sm:$0xff]  }
  0x2f   :  { %659 = vmatprep.subr.bf16.mxu0 %v1143_v19  ;;  %699 = vmatpush1.bf16.msra.mxu1 %v1142_v20  ;;  %v1193_v58 = vld [vmem:[#allocation2 + $0xa0] ss:$8 sps:$4 sm:$0xff]   ;;  %v1197_v59 = vld [vmem:[#allocation2 + $0x94] ss:$8 sps:$4 sm:$0xff]   ;;  %v1199_v62 = vld [vmem:[#allocation2 + $0x90] ss:$8 sps:$4 sm:$0xff]  }
  0x30   :  { %700 = vmatprep.subr.bf16.mxu1 %v1146_v21  ;;  %681 = vmatprep.mubr.bf16.mxu0 %v56_v48  ;;  %v1196_v60 = vld [vmem:[#allocation2 + $0x1a0] ss:$8 sps:$4 sm:$0xff]   ;;  %v1200_v61 = vld [vmem:[#allocation2 + $0x194] ss:$8 sps:$4 sm:$0xff]   ;;  %v1203_v63 = vld [vmem:[#allocation2 + $0x84] ss:$8 sps:$4 sm:$0xff]  }
  0x31   :  { %722 = vmatprep.mubr.bf16.mxu1 %v58_v52  ;;  %v1202_v0 = vld [vmem:[#allocation2 + $0x190] ss:$8 sps:$4 sm:$0xff]   ;;  %v1205_v1 = vld [vmem:[#allocation2 + $0x80] ss:$8 sps:$4 sm:$0xff]   ;;  %v1206_v2 = vld [vmem:[#allocation2 + $0x184] ss:$8 sps:$4 sm:$0xff]  }
  0x32   :  { %660 = vmatpush1.bf16.msra.mxu0 %v1145_v22  ;;  %v1208_v3 = vld [vmem:[#allocation2 + $0x180] ss:$8 sps:$4 sm:$0xff]   ;;  %v1211_v5 = vld [vmem:[#allocation2 + $0x274] ss:$8 sps:$4 sm:$0xff]   ;;  %v1209_v8 = vld [vmem:[#allocation2 + $0x270] ss:$8 sps:$4 sm:$0xff]  }
  0x33   :  { %661 = vmatprep.subr.bf16.mxu0 %v1149_v23  ;;  %701 = vmatpush1.bf16.msra.mxu1 %v1148_v24  ;;  %v49_v4 = vld [vmem:[%s1390_s0] sm:$0xff]  ;;  %v51_v6 = vld [vmem:[%s1390_s0 + $0x10] sm:$0xff]  ;;  %v54_v12 = vld [vmem:[%s1390_s0 + $0x28] sm:$0xff] }
  0x34   :  { %702 = vmatprep.subr.bf16.mxu1 %v1152_v25  ;;  %v55_v7 = vpack.c.bf16 %v49_v4, %v49_v4  ;;  %v57_v9 = vpack.c.bf16 %v51_v6, %v51_v6  ;;  %v1214_v10 = vld [vmem:[#allocation2 + $0x264] ss:$8 sps:$4 sm:$0xff]   ;;  %v1212_v11 = vld [vmem:[#allocation2 + $0x260] ss:$8 sps:$4 sm:$0xff]   ;;  %v1217_v13 = vld [vmem:[#allocation2 + $0x254] ss:$8 sps:$4 sm:$0xff]   ;;  %v60_v14 = vpack.c.bf16 %v54_v12, %v54_v12  ;;  %v159_v4 = vlaneseq }
  0x35   :  { %v1215_v15 = vld [vmem:[#allocation2 + $0x250] ss:$8 sps:$4 sm:$0xff]   ;;  %v1220_v16 = vld [vmem:[#allocation2 + $0x244] ss:$8 sps:$4 sm:$0xff]   ;;  %v1218_v17 = vld [vmem:[#allocation2 + $0x240] ss:$8 sps:$4 sm:$0xff]  }
  0x36   :  { %662 = vmatpush1.bf16.msra.mxu0 %v1151_v26  ;;  %v1223_v18 = vld [vmem:[#allocation2 + $0x234] ss:$8 sps:$4 sm:$0xff]   ;;  %v1221_v19 = vld [vmem:[#allocation2 + $0x230] ss:$8 sps:$4 sm:$0xff]   ;;  %v1226_v20 = vld [vmem:[#allocation2 + $0x224] ss:$8 sps:$4 sm:$0xff]  }
  0x37   :  { %663 = vmatprep.subr.bf16.mxu0 %v1155_v27  ;;  %703 = vmatpush1.bf16.msra.mxu1 %v1154_v28  ;;  %v1224_v21 = vld [vmem:[#allocation2 + $0x220] ss:$8 sps:$4 sm:$0xff]   ;;  %v1229_v22 = vld [vmem:[#allocation2 + $0x214] ss:$8 sps:$4 sm:$0xff]   ;;  %v1227_v23 = vld [vmem:[#allocation2 + $0x210] ss:$8 sps:$4 sm:$0xff]  }
  0x38   :  { %704 = vmatprep.subr.bf16.mxu1 %v1158_v29  ;;  %v1232_v24 = vld [vmem:[#allocation2 + $0x204] ss:$8 sps:$4 sm:$0xff]   ;;  %v1230_v25 = vld [vmem:[#allocation2 + $0x200] ss:$8 sps:$4 sm:$0xff]   ;;  %v1235_v26 = vld [vmem:[#allocation2 + $0x2f4] ss:$8 sps:$4 sm:$0xff]  }
  0x39   :  { %v1233_v27 = vld [vmem:[#allocation2 + $0x2f0] ss:$8 sps:$4 sm:$0xff]   ;;  %v1238_v28 = vld [vmem:[#allocation2 + $0x2e4] ss:$8 sps:$4 sm:$0xff]   ;;  %v1236_v29 = vld [vmem:[#allocation2 + $0x2e0] ss:$8 sps:$4 sm:$0xff]  }
  0x3a   :  { %664 = vmatpush1.bf16.msra.mxu0 %v1157_v30  ;;  %v1241_v30 = vld [vmem:[#allocation2 + $0x2d4] ss:$8 sps:$4 sm:$0xff]   ;;  %v1261_v48 = vld [vmem:[#allocation4 + $0x68] sm:$0xff]   ;;  %v1263_v50 = vld [vmem:[#allocation4 + $0x60] sm:$0xff]  }
  0x3b   :  { %665 = vmatprep.subr.bf16.mxu0 %v1161_v31  ;;  %705 = vmatpush1.bf16.msra.mxu1 %v1160_v32  ;;  %v1239_v31 = vld [vmem:[#allocation2 + $0x2d0] ss:$8 sps:$4 sm:$0xff]   ;;  %v1244_v32 = vld [vmem:[#allocation2 + $0x2c4] ss:$8 sps:$4 sm:$0xff]  }
  0x3c   :  { %706 = vmatprep.subr.bf16.mxu1 %v1164_v33  ;;  %v1242_v33 = vld [vmem:[#allocation2 + $0x2c0] ss:$8 sps:$4 sm:$0xff]   ;;  %v1259_v46 = vld [vmem:[#allocation4 + $0x70] sm:$0xff]   ;;  %v1265_v52 = vld [vmem:[#allocation4 + $0x58] sm:$0xff]  }
  0x3e   :  { %666 = vmatpush2.bf16.msra.mxu0 %v1163_v34  ;;  %v1247_v34 = vld [vmem:[#allocation2 + $0x2b4] ss:$8 sps:$4 sm:$0xff]  }
  0x3f   :  { %667 = vmatprep.subr.bf16.mxu0 %v1167_v35  ;;  %707 = vmatpush2.bf16.msra.mxu1 %v1166_v36  ;;  %v1245_v35 = vld [vmem:[#allocation2 + $0x2b0] ss:$8 sps:$4 sm:$0xff]   ;;  %v1250_v36 = vld [vmem:[#allocation2 + $0x2a4] ss:$8 sps:$4 sm:$0xff]  }
  0x40   :  { %708 = vmatprep.subr.bf16.mxu1 %v1170_v37  ;;  %v1248_v37 = vld [vmem:[#allocation2 + $0x2a0] ss:$8 sps:$4 sm:$0xff]  }
  0x42   :  { %668 = vmatpush2.bf16.msra.mxu0 %v1169_v38  ;;  %v1253_v38 = vld [vmem:[#allocation2 + $0x294] ss:$8 sps:$4 sm:$0xff]  }
  0x43   :  { %669 = vmatprep.subr.bf16.mxu0 %v1173_v39  ;;  %709 = vmatpush2.bf16.msra.mxu1 %v1172_v40  ;;  %v1251_v39 = vld [vmem:[#allocation2 + $0x290] ss:$8 sps:$4 sm:$0xff]   ;;  %v1256_v40 = vld [vmem:[#allocation2 + $0x284] ss:$8 sps:$4 sm:$0xff]  }
  0x44   :  { %710 = vmatprep.subr.bf16.mxu1 %v1176_v41  ;;  %v1254_v41 = vld [vmem:[#allocation2 + $0x280] ss:$8 sps:$4 sm:$0xff]  }
  0x46   :  { %670 = vmatpush2.bf16.msra.mxu0 %v1175_v42  ;;  %v53_v42 = vld [vmem:[%s1390_s0 + $0x20] sm:$0xff] }
  0x47   :  { %671 = vmatprep.subr.bf16.mxu0 %v1179_v43  ;;  %711 = vmatpush2.bf16.msra.mxu1 %v1178_v44  ;;  %v59_v43 = vpack.c.bf16 %v53_v42, %v53_v42  ;;  %v1257_v44 = vld [vmem:[#allocation4 + $0x78] sm:$0xff]  }
  0x48   :  { %712 = vmatprep.subr.bf16.mxu1 %v1182_v45  ;;  %v1258_v45 = vld [vmem:[#allocation4 + $0x38] sm:$0xff]  }
  0x4a   :  { %672 = vmatpush2.bf16.msra.mxu0 %v1181_v47  ;;  %v1260_v47 = vld [vmem:[#allocation4 + $0x30] sm:$0xff]  }
  0x4b   :  { %673 = vmatprep.subr.bf16.mxu0 %v1185_v49  ;;  %713 = vmatpush2.bf16.msra.mxu1 %v1184_v51  ;;  %v1262_v49 = vld [vmem:[#allocation4 + $0x28] sm:$0xff]   ;;  %v1264_v51 = vld [vmem:[#allocation4 + $0x20] sm:$0xff]  }
  0x4c   :  { %714 = vmatprep.subr.bf16.mxu1 %v1188_v53  ;;  %v1266_v53 = vld [vmem:[#allocation4 + $0x18] sm:$0xff]  }
  0x4e   :  { %674 = vmatpush2.bf16.msra.mxu0 %v1187_v54  ;;  %v1267_v54 = vld [vmem:[#allocation4 + $0x50] sm:$0xff]  }
  0x4f   :  { %675 = vmatprep.subr.bf16.mxu0 %v1191_v55  ;;  %715 = vmatpush2.bf16.msra.mxu1 %v1190_v56  ;;  %v1268_v55 = vld [vmem:[#allocation4 + $0x10] sm:$0xff]   ;;  %v1269_v56 = vld [vmem:[#allocation4 + $0x48] sm:$0xff]  }
  0x50   :  { %716 = vmatprep.subr.bf16.mxu1 %v1194_v57  ;;  %v1270_v57 = vld [vmem:[#allocation4 + $0x8] sm:$0xff]  }
  0x52   :  { %676 = vmatpush2.bf16.msra.mxu0 %v1193_v58  ;;  %v1271_v58 = vld [vmem:[#allocation4 + $0x40] sm:$0xff]  }
  0x53   :  { %677 = vmatprep.subr.bf16.mxu0 %v1197_v59  ;;  %717 = vmatpush2.bf16.msra.mxu1 %v1196_v60  ;;  %v1272_v59 = vld [vmem:[#allocation4] sm:$0xff]  }
  0x54   :  { %718 = vmatprep.subr.bf16.mxu1 %v1200_v61 }
  0x56   :  { %678 = vmatpush2.bf16.msra.mxu0 %v1199_v62 }
  0x57   :  { %679 = vmatprep.subr.bf16.mxu0 %v1203_v63  ;;  %719 = vmatpush2.bf16.msra.mxu1 %v1202_v0 }
  0x58   :  { %720 = vmatprep.subr.bf16.mxu1 %v1206_v2 }
  0x5a   :  { %680 = vmatpush2.bf16.msra.mxu0 %v1205_v1 }
  0x5b   :  { %731 = vmatprep.subr.bf16.mxu0 %v1211_v5  ;;  %721 = vmatpush2.bf16.msra.mxu1 %v1208_v3  ;;  %v160_v5 = vshrl.u32 %v159_v4, 7 }
  0x5c   :  { %1085 = vmatprep.subr.bf16.mxu1 %v1257_v44 }
  0x5d   :  { %682 = vmatmul.mubr.bf16.vlgmr.msra.gmra.mxu0 %v55_v7  ;;  %v161_v6 = vsub.s32 0, %v160_v5  ;;  %v157_v7 = vld [vmem:[%s1392_s2] sm:$0x3] }
  0x5e   :  { %732 = vmatpush1.bf16.msra.mxu0 %v1209_v8  ;;  %723 = vmatmul.mubr.bf16.vlgmr.msra.gmra.mxu1 %v57_v9  ;;  %v165_v8 = vsub.s32 1, %v160_v5 }
  0x5f   :  { %733 = vmatprep.subr.bf16.mxu0 %v1214_v10  ;;  %763 = vmatprep.mubr.bf16.mxu0 %v60_v14  ;;  %v162_v9 = vrot.slane %v157_v7, %v161_v6 }
  0x60   :  { %1086 = vmatpush3.bf16.msra.mxu1 %v1258_v45  ;;  %v166_v10 = vrot.slane %v157_v7, %v165_v8 }
  0x61   :  { %1087 = vmatprep.subr.bf16.mxu1 %v1259_v46 }
  0x62   :  { %734 = vmatpush1.bf16.msra.mxu0 %v1212_v11 }
  0x63   :  { %735 = vmatprep.subr.bf16.mxu0 %v1217_v13 }
  0x64   :  { %1088 = vmatpush3.bf16.msra.mxu1 %v1260_v47 }
  0x65   :  { %1089 = vmatprep.subr.bf16.mxu1 %v1261_v48 }
  0x66   :  { %736 = vmatpush1.bf16.msra.mxu0 %v1215_v15 }
  0x67   :  { %737 = vmatprep.subr.bf16.mxu0 %v1220_v16 }
  0x68   :  { %1090 = vmatpush3.bf16.msra.mxu1 %v1262_v49 }
  0x69   :  { %1091 = vmatprep.subr.bf16.mxu1 %v1263_v50 }
  0x6a   :  { %738 = vmatpush1.bf16.msra.mxu0 %v1218_v17 }
  0x6b   :  { %739 = vmatprep.subr.bf16.mxu0 %v1223_v18 }
  0x6c   :  { %1092 = vmatpush3.bf16.msra.mxu1 %v1264_v51 }
  0x6d   :  { %1093 = vmatprep.subr.bf16.mxu1 %v1265_v52 }
  0x6e   :  { %740 = vmatpush1.bf16.msra.mxu0 %v1221_v19 }
  0x6f   :  { %741 = vmatprep.subr.bf16.mxu0 %v1226_v20 }
  0x70   :  { %1094 = vmatpush3.bf16.msra.mxu1 %v1266_v53 }
  0x71   :  { %1095 = vmatprep.subr.bf16.mxu1 %v1267_v54 }
  0x72   :  { %742 = vmatpush1.bf16.msra.mxu0 %v1224_v21 }
  0x73   :  { %743 = vmatprep.subr.bf16.mxu0 %v1229_v22 }
  0x74   :  { %1096 = vmatpush3.bf16.msra.mxu1 %v1268_v55 }
  0x75   :  { %1097 = vmatprep.subr.bf16.mxu1 %v1269_v56 }
  0x76   :  { %744 = vmatpush1.bf16.msra.mxu0 %v1227_v23 }
  0x77   :  { %745 = vmatprep.subr.bf16.mxu0 %v1232_v24 }
  0x78   :  { %1098 = vmatpush3.bf16.msra.mxu1 %v1270_v57 }
  0x79   :  { %1099 = vmatprep.subr.bf16.mxu1 %v1271_v58 }
  0x7a   :  { %746 = vmatpush1.bf16.msra.mxu0 %v1230_v25 }
  0x7b   :  { %747 = vmatprep.subr.bf16.mxu0 %v1235_v26  ;;  %v952_v26 = vand.u32 127, %v159_v4 }
  0x7c   :  { %1100 = vmatpush3.bf16.msra.mxu1 %v1272_v59 }
  0x7d   :  { %vm953_vm0 = vcmp.lt.s32.totalorder %v952_v26, 40 }
  0x7e   :  { %748 = vmatpush2.bf16.msra.mxu0 %v1233_v27 }
  0x7f   :  { %749 = vmatprep.subr.bf16.mxu0 %v1238_v28  ;;  %v1068_v28 = vld [vmem:[%s1394_s4] ss:$0 sm:$0xff] }
  0x82   :  { %750 = vmatpush2.bf16.msra.mxu0 %v1236_v29 }
  0x83   :  { %751 = vmatprep.subr.bf16.mxu0 %v1241_v30 }
  0x86   :  { %752 = vmatpush2.bf16.msra.mxu0 %v1239_v31 }
  0x87   :  { %753 = vmatprep.subr.bf16.mxu0 %v1244_v32 }
  0x8a   :  { %754 = vmatpush2.bf16.msra.mxu0 %v1242_v33 }
  0x8b   :  { %755 = vmatprep.subr.bf16.mxu0 %v1247_v34 }
  0x8e   :  { %756 = vmatpush2.bf16.msra.mxu0 %v1245_v35 }
  0x8f   :  { %757 = vmatprep.subr.bf16.mxu0 %v1250_v36 }
  0x92   :  { %758 = vmatpush2.bf16.msra.mxu0 %v1248_v37 }
  0x93   :  { %759 = vmatprep.subr.bf16.mxu0 %v1253_v38 }
  0x96   :  { %760 = vmatpush2.bf16.msra.mxu0 %v1251_v39 }
  0x97   :  { %761 = vmatprep.subr.bf16.mxu0 %v1256_v40 }
  0x9a   :  { %762 = vmatpush2.bf16.msra.mxu0 %v1254_v41 }
  0x9d   :  { %764 = vmatmul.mubr.bf16.vlgmr.msra.gmra.mxu0 %v59_v43 }
 0x11d   :  { %v683_v60 = vpop.f32.mrf.mxu0 }
 0x11e   :  { %v724_v62 = vpop.f32.mrf.mxu1  ;;  %v684_v11 = vadd.f32 %v683_v60, %v162_v9 }
 0x11f   :  { %v685_v61 = vpop.f32.mrf.mxu0 }
 0x120   :  { %v726_v0 = vpop.f32.mrf.mxu1  ;;  %v686_v12 = vadd.f32 %v685_v61, %v166_v10  ;;  %v725_v13 = vadd.f32 %v724_v62, %v684_v11 }
 0x121   :  { %v687_v63 = vpop.f32.mrf.mxu0 }
 0x122   :  { %v728_v2 = vpop.f32.mrf.mxu1  ;;  %v727_v15 = vadd.f32 %v726_v0, %v686_v12 }
 0x123   :  { %v688_v1 = vpop.f32.mrf.mxu0 }
 0x124   :  { %v729_v3 = vpop.f32.mrf.mxu1 }
 0x15d   :  { %v765_v14 = vpop.f32.mrf.mxu0 }
 0x15e   :  { %v766_v16 = vadd.f32 %v765_v14, %v725_v13 }
 0x15f   :  { %v767_v17 = vpop.f32.mrf.mxu0 }
 0x160   :  { %v768_v18 = vadd.f32 %v767_v17, %v727_v15  ;;  %v772_v19 = vmax.f32 %v766_v16, 0.0 }
 0x161   :  { %v769_v20 = vpop.f32.mrf.mxu0 }
 0x162   :  { %v773_v21 = vmax.f32 %v768_v18, 0.0  ;;  %v774_v24 = vpack.c.bf16 %v772_v19, %v772_v19 }
 0x163   :  { %v770_v22 = vpop.f32.mrf.mxu0 }
 0x164   :  { %v775_v23 = vpack.c.bf16 %v773_v21, %v773_v21 }
 0x166   :  { %943 = vmatprep.mubr.bf16.mxu1 %v775_v23 }
 0x167   :  { %944 = vmatmul.mubr.bf16.vlgmr.msra.gmra.mxu1 %v774_v24 }
 0x227   :  { %v1101_v25 = vpop.f32.mrf.mxu1 }
 0x229   :  { %v1102_v27 = vpop.f32.mrf.mxu1 }
 0x22a   :  { %v1103_v29 = vadd.f32 %v1102_v27, %v1101_v25 }
 0x22b   :  { %v1104_v30 = vpop.f32.mrf.mxu1 }
 0x22c   :  { %v946_v31 = vadd.f32 %v1103_v29, %v1068_v28 }
 0x22d   :  { %v1105_v32 = vpop.f32.mrf.mxu1 }
 0x22e   :  { %v954_v33 = vsel %vm953_vm0, %v946_v31, -inf }
 0x22f   :  { %955 = vmax.xlane.f32.xlu0 %v954_v33 }
 0x2b8   :  { %v956_v34 = vpop.xlane.xlu0 %955 }
 0x2b9   :  { %v957_v35 = vsub.f32 %v954_v33, %v956_v34 }
 0x2bb   :  { %v958_v36 = vmul.f32 1.442695, %v957_v35 }
 0x2bd   :  { %1273 = vpow2.f32 %v958_v36 }
 0x2ca   :  { %v1274_v37 = vpop.eup %1273 }
 0x2cb   :  { %960 = vadd.xlane.f32.xlu0 %v1274_v37 }
 0x354   :  { %v961_v38 = vpop.xlane.xlu0 %960 }
 0x355   :  { %1275 = vrcp.f32 %v961_v38 }
 0x362   :  { %v1276_v39 = vpop.eup %1275 }
 0x363   :  { %v963_v40 = vmul.f32 %v1276_v39, %v1274_v37 }
 0x365   :  { %v964_v41 = vsel %vm953_vm0, %v963_v40, %v946_v31 }
 0x366   :  { %965 = vst [vmem:[%s1395_s5] sm:$0xff] %v964_v41 }
 0x367   :  { %970 = vsyncpa [#allocation3], 1 }
 0x368   :  { %971 = vsyncpa [#allocation5], 1 }

</bundles_post_ra>
